<compile_context>
chip_gen: v5e
topology: v5e:2x2
jax: 0.10.0
libtpu: 0.0.40
codegen_flags: <defaults>
</compile_context>

<pallas_src>
import functools

import jax
import jax.numpy as jnp
from jax.experimental import pallas as pl
from jax.experimental.pallas import tpu as pltpu


def _label_smoothing_kernel(pred_ref, tgt_ref, out_ref, *,
                            n_rows, n_classes, smoothing, tile_n):
    i = pl.program_id(0)

    confidence = 1.0 - smoothing
    smooth_val = smoothing / (n_classes - 1)

    pred = pred_ref[...].astype(jnp.float32)       # (TN, C) f32 compute
    tgt = tgt_ref[...]                             # (TN, 1) int32

    # Numerically stable log-softmax pieces; class axis = lane axis (XLU reductions).
    m = jnp.max(pred, axis=-1, keepdims=True)                            # (TN, 1)
    sum_exp = jnp.sum(jnp.exp(pred - m), axis=-1, keepdims=True)         # (TN, 1)
    lse = jnp.log(sum_exp)                                               # (TN, 1)

    # sum_c logp = sum_c pred - C*(m + lse) ;  logp[tgt] = pred[tgt] - m - lse
    s_pred = jnp.sum(pred, axis=-1, keepdims=True)                       # (TN, 1)
    col = jax.lax.broadcasted_iota(jnp.int32, pred.shape, 1)
    pred_tgt = jnp.sum(jnp.where(col == tgt, pred, 0.0),
                       axis=-1, keepdims=True)                           # (TN, 1)

    sum_logp = s_pred - n_classes * (m + lse)
    logp_tgt = pred_tgt - m - lse
    per_row = -(smooth_val * sum_logp
                + (confidence - smooth_val) * logp_tgt)                  # (TN, 1)

    # Mask overhanging edge-block rows (unspecified data) BEFORE the cross-row
    # sum; jnp.where drops any NaN/Inf coming from garbage rows.
    row = jax.lax.broadcasted_iota(jnp.int32, per_row.shape, 0) + i * tile_n
    per_row = jnp.where(row < n_rows, per_row, 0.0)

    out_ref[0, 0] = jnp.sum(per_row)               # per-tile partial sum (SMEM)


def _choose_tile_n(n, c, itemsize):
    """Row-tile size from a ~1 MiB pred-tile byte budget.

    ~1 MiB input tiles sit near the measured HBM-roofline plateau while
    leaving room for: the double-buffered input, the lane-padded (TN,1) int32
    target buffer, and the (TN,C)/(TN,1) f32 in-kernel temporaries — all well
    inside v7x's 64 MiB physical VMEM (and trivially inside v5e/v6e's 128 MiB).
    TN is rounded to the dtype's sublane-packing multiple and capped at 4096
    so the lane-padded narrow buffers stay bounded for very small C.
    """
    budget = 1 << 20                                  # ~1 MiB pred tile
    mult = max(8, 32 // max(1, itemsize))             # f32:8  bf16:16  int8:32
    tn = budget // max(1, c * itemsize)
    tn = max(mult, (tn // mult) * mult)
    tn = min(tn, 4096)
    n_round = ((n + mult - 1) // mult) * mult          # don't exceed (rounded) N
    return max(mult, min(tn, n_round))


def label_smoothing_loss(pred, target, *, classes, smoothing=0.1):
    n, c = pred.shape
    assert c == classes
    itemsize = jnp.dtype(pred.dtype).itemsize

    tile_n = _choose_tile_n(n, c, itemsize)
    num_tiles = pl.cdiv(n, tile_n)

    # Targets stay unpadded too: the overhanging edge block is masked in-kernel.
    tgt2d = target.astype(jnp.int32).reshape(n, 1)

    kernel = functools.partial(
        _label_smoothing_kernel,
        n_rows=n, n_classes=classes, smoothing=float(smoothing), tile_n=tile_n,
    )

    partials = pl.pallas_call(
        kernel,
        out_shape=jax.ShapeDtypeStruct((1, num_tiles), jnp.float32),
        grid_spec=pltpu.PrefetchScalarGridSpec(
            num_scalar_prefetch=0,
            grid=(num_tiles,),
            in_specs=[
                pl.BlockSpec((tile_n, c), lambda i: (i, 0)),   # pred tile (VMEM)
                pl.BlockSpec((tile_n, 1), lambda i: (i, 0)),   # target tile (VMEM)
            ],
            # One scalar partial per grid step -> disjoint output blocks, so the
            # grid axis can be "parallel" (both v7x TensorCores stream tiles).
            out_specs=pl.BlockSpec((1, 1), lambda i: (0, i),
                                   memory_space=pltpu.SMEM),
        ),
        compiler_params=pltpu.CompilerParams(
            dimension_semantics=("parallel",),
            vmem_limit_bytes=48 * 1024 * 1024,   # valid on v5e/v6e/v7x; covers f32 temps
        ),
        cost_estimate=pl.CostEstimate(
            flops=6 * n * c,
            transcendentals=n * c,
            bytes_accessed=n * c * itemsize + n * 4 + num_tiles * 4,
        ),
    )(pred, tgt2d)

    return jnp.sum(partials) * (1.0 / n)


def _reference(pred, target, *, classes, smoothing):
    confidence = 1.0 - smoothing
    logp = jax.nn.log_softmax(pred.astype(jnp.float32), axis=-1)
    true_dist = jnp.full_like(logp, smoothing / (classes - 1))
    true_dist = true_dist.at[jnp.arange(pred.shape[0]), target].set(confidence)
    return jnp.mean(jnp.sum(-true_dist * logp, axis=-1))


if __name__ == "__main__":
    key = jax.random.PRNGKey(0)
    k1, k2, k3, k4, k5, k6 = jax.random.split(key, 6)
    smoothing = 0.1

    # case 1: tiny exact-fit tile (batch=8, classes=32), f32 logits
    N, C = 8, 32
    pred = jax.random.normal(k1, (N, C), dtype=jnp.float32)
    target = jax.random.randint(k2, (N,), 0, C, dtype=jnp.int32)
    loss = jax.block_until_ready(
        label_smoothing_loss(pred, target, classes=C, smoothing=smoothing))
    ref = _reference(pred, target, classes=C, smoothing=smoothing)
    assert jnp.allclose(loss, ref, atol=1e-4, rtol=1e-4), (loss, ref)

    # case 2: ragged batch (row-mask path) with bf16 logits
    N2, C2 = 20, 96
    pred2 = jax.random.normal(k3, (N2, C2), dtype=jnp.bfloat16)
    target2 = jax.random.randint(k4, (N2,), 0, C2, dtype=jnp.int32)
    loss2 = jax.block_until_ready(
        label_smoothing_loss(pred2, target2, classes=C2, smoothing=smoothing))
    ref2 = _reference(pred2, target2, classes=C2, smoothing=smoothing)
    assert jnp.allclose(loss2, ref2, atol=1e-3, rtol=1e-3), (loss2, ref2)

    # case 3: multi-tile grid with an overhanging edge block (exercises the
    # "parallel" partial-sum path + in-kernel masking, no wrapper pad)
    N3, C3 = 1100, 512
    pred3 = jax.random.normal(k5, (N3, C3), dtype=jnp.float32)
    target3 = jax.random.randint(k6, (N3,), 0, C3, dtype=jnp.int32)
    loss3 = jax.block_until_ready(
        label_smoothing_loss(pred3, target3, classes=C3, smoothing=smoothing))
    ref3 = _reference(pred3, target3, classes=C3, smoothing=smoothing)
    assert jnp.allclose(loss3, ref3, atol=1e-3, rtol=1e-4), (loss3, ref3)

    print("KERNEL_OK")
</pallas_src>

<mosaic_0001>
module attributes {stable_mosaic.version = 11 : i64} {
  func.func @_label_smoothing_kernel(%arg0: i32, %arg1: memref<8x32xf32, #tpu.memory_space<vmem>>, %arg2: memref<8x1xi32, #tpu.memory_space<vmem>>, %arg3: memref<1x1xf32, #tpu.memory_space<smem>>) attributes {dimension_semantics = [#tpu.dimension_semantics<parallel>], iteration_bounds = array<i64: 1>, scalar_prefetch = 0 : i64, scratch_operands = 0 : i64, tpu.core_type = #tpu.core_type<tc>, window_params = [{transform_indices = @transform_0, window_bounds = array<i64: 8, 32>}, {transform_indices = @transform_1, window_bounds = array<i64: 8, 1>}, {transform_indices = @transform_2, window_bounds = array<i64: 1, 1>}]} {
    %c0 = arith.constant 0 : index
    %c0_0 = arith.constant 0 : index
    %0 = vector.load %arg1[%c0, %c0_0] : memref<8x32xf32, #tpu.memory_space<vmem>>, vector<8x32xf32>
    %c0_1 = arith.constant 0 : index
    %c0_2 = arith.constant 0 : index
    %1 = vector.load %arg2[%c0_1, %c0_2] : memref<8x1xi32, #tpu.memory_space<vmem>>, vector<8x1xi32>
    %cst = arith.constant dense<0xFF800000> : vector<8xf32>
    %2 = vector.multi_reduction <maximumf>, %0, %cst [1] : vector<8x32xf32> to vector<8xf32>
    %3 = vector.shape_cast %2 : vector<8xf32> to vector<8x1xf32>
    %4 = vector.broadcast %3 : vector<8x1xf32> to vector<8x32xf32>
    %5 = arith.subf %0, %4 : vector<8x32xf32>
    %6 = math.exp %5 : vector<8x32xf32>
    %cst_3 = arith.constant dense<0.000000e+00> : vector<8xf32>
    %7 = vector.multi_reduction <add>, %6, %cst_3 [1] : vector<8x32xf32> to vector<8xf32>
    %8 = vector.shape_cast %7 : vector<8xf32> to vector<8x1xf32>
    %9 = math.log %8 : vector<8x1xf32>
    %cst_4 = arith.constant dense<0.000000e+00> : vector<8xf32>
    %10 = vector.multi_reduction <add>, %0, %cst_4 [1] : vector<8x32xf32> to vector<8xf32>
    %11 = vector.shape_cast %10 : vector<8xf32> to vector<8x1xf32>
    %12 = tpu.iota {dimensions = array<i32: 1>} : vector<8x32xi32>
    %13 = vector.broadcast %1 : vector<8x1xi32> to vector<8x32xi32>
    %14 = arith.cmpi eq, %12, %13 : vector<8x32xi32>
    %cst_5 = arith.constant 0.000000e+00 : f32
    %15 = vector.broadcast %cst_5 : f32 to vector<8x32xf32>
    %16 = arith.select %14, %0, %15 : vector<8x32xi1>, vector<8x32xf32>
    %cst_6 = arith.constant dense<0.000000e+00> : vector<8xf32>
    %17 = vector.multi_reduction <add>, %16, %cst_6 [1] : vector<8x32xf32> to vector<8xf32>
    %18 = vector.shape_cast %17 : vector<8xf32> to vector<8x1xf32>
    %19 = arith.addf %3, %9 : vector<8x1xf32>
    %cst_7 = arith.constant 3.200000e+01 : f32
    %20 = vector.broadcast %cst_7 : f32 to vector<8x1xf32>
    %21 = arith.mulf %20, %19 : vector<8x1xf32>
    %22 = arith.subf %11, %21 : vector<8x1xf32>
    %23 = arith.subf %18, %3 : vector<8x1xf32>
    %24 = arith.subf %23, %9 : vector<8x1xf32>
    %cst_8 = arith.constant 0.0032258064 : f32
    %25 = vector.broadcast %cst_8 : f32 to vector<8x1xf32>
    %26 = arith.mulf %25, %22 : vector<8x1xf32>
    %cst_9 = arith.constant 0.896774172 : f32
    %27 = vector.broadcast %cst_9 : f32 to vector<8x1xf32>
    %28 = arith.mulf %27, %24 : vector<8x1xf32>
    %29 = arith.addf %26, %28 : vector<8x1xf32>
    %cst_10 = arith.constant 0.000000e+00 : f32
    %30 = vector.broadcast %cst_10 : f32 to vector<8x1xf32>
    %31 = arith.subf %30, %29 : vector<8x1xf32>
    %32 = tpu.iota {dimensions = array<i32: 0>} : vector<8x1xi32>
    %c8_i32 = arith.constant 8 : i32
    %33 = arith.muli %arg0, %c8_i32 : i32
    %34 = vector.broadcast %33 : i32 to vector<8x1xi32>
    %35 = arith.addi %32, %34 : vector<8x1xi32>
    %c8_i32_11 = arith.constant 8 : i32
    %36 = vector.broadcast %c8_i32_11 : i32 to vector<8x1xi32>
    %37 = arith.cmpi slt, %35, %36 : vector<8x1xi32>
    %cst_12 = arith.constant 0.000000e+00 : f32
    %38 = vector.broadcast %cst_12 : f32 to vector<8x1xf32>
    %39 = arith.select %37, %31, %38 : vector<8x1xi1>, vector<8x1xf32>
    %40 = vector.shape_cast %39 : vector<8x1xf32> to vector<1x8x1xf32>
    %cst_13 = arith.constant dense<0.000000e+00> : vector<1xf32>
    %41 = vector.multi_reduction <add>, %40, %cst_13 [1, 2] : vector<1x8x1xf32> to vector<1xf32>
    %42 = vector.shape_cast %41 : vector<1xf32> to vector<1x1x1xf32>
    %43 = vector.extract %42[0, 0, 0] : f32 from vector<1x1x1xf32>
    %c0_14 = arith.constant 0 : index
    %c0_15 = arith.constant 0 : index
    %44 = memref.load %arg3[%c0_14, %c0_15] : memref<1x1xf32, #tpu.memory_space<smem>>
    memref.store %43, %arg3[%c0_14, %c0_15] : memref<1x1xf32, #tpu.memory_space<smem>>
    return
  }
  func.func @transform_0(%arg0: i32) -> (i32, i32) {
    %c0_i32 = arith.constant 0 : i32
    %c0_i32_0 = arith.constant 0 : i32
    return %arg0, %c0_i32 : i32, i32
  }
  func.func @transform_1(%arg0: i32) -> (i32, i32) {
    %c0_i32 = arith.constant 0 : i32
    %c0_i32_0 = arith.constant 0 : i32
    return %arg0, %c0_i32 : i32, i32
  }
  func.func @transform_2(%arg0: i32) -> (i32, i32) {
    %c0_i32 = arith.constant 0 : i32
    %c0_i32_0 = arith.constant 0 : i32
    return %c0_i32, %arg0 : i32, i32
  }
}

</mosaic_0001>

<bundles_post_ra>
// kernel: tpu_custom_call.1
= control target key start
LH: loop header
LB: loop body
LE: loop exit
PB: predicated region body
PF: predicated region fallthrough
CT: control target
= control target key end

     0   :  { %vm14_vm0 = vcmask 261120   ;;  %s136_s0 = inlined_call_operand.vmem [shape: f32[8,32], index: 0, kind: input, shape index: {}]   ;;  %s137_s1 = inlined_call_operand.vmem [shape: s32[8,1], index: 1, kind: input, shape index: {}]   ;;  %s138_s2 = inlined_call_operand.hbm [shape: f32[1,1], index: 2, kind: output, shape index: {}]  }
   0x1   :  { %v12_v0 = vld [vmem:[%s136_s0] sm:$0xff] }
   0x2   :  { %7 = vsyncpa [#allocation3], 0  ;;  %v15_v1 = vsel %vm14_vm0, %v12_v0, -inf  ;;  %v106_v2 = vmov 0   ;;  %v13_v3 = vld [vmem:[%s137_s1] sm:$0xff]  ;;  %v26_v4 = vsel %vm14_vm0, %v12_v0, 0.0  ;;  %v29_v10 = vlaneseq }
   0x3   :  { %87 = vset.pattern.permute.xlu0 %v106_v2  ;;  %27 = vadd.xlane.f32.xlu2 %v26_v4  ;;  %vm55_vm2 = vcmask 7168   ;;  %s73_s13 = sshll.u32 %s138_s2, 4  ;;  %s107_s15 = smov [#allocation2]   ;;  %s74_s13 = int_to_ptr.hbm [resolvable:$true] %s73_s13 }
   0x4   :  { %16 = vmax.xlane.f32.xlu0 %v15_v1  ;;  %v30_v11 = vand.u32 127, %v29_v10 }
  0x18   :  { %32 = vperm.xlu0 %87, %v13_v3  }
  0x76   :  { %v28_v21 = vpop.xlane.xlu2 %27 }
  0x77   :  { %v17_v5 = vpop.xlane.xlu0 %16 }
  0x78   :  { %v18_v6 = vsub.f32 %v12_v0, %v17_v5 }
  0x7a   :  { %v19_v7 = vmul.f32 1.442695, %v18_v6 }
  0x7c   :  { %88 = vpow2.f32 %v19_v7 }
  0x82   :  { %v89_v8 = vpop.eup %88 }
  0x83   :  { %v21_v9 = vsel %vm14_vm0, %v89_v8, 0.0 }
  0x84   :  { %22 = vadd.xlane.f32.xlu1 %v21_v9 }
  0x8a   :  { %v33_v12 = vpop.permute.xlu0 %32 }
  0x8b   :  { %vm34_vm1 = vcmp.eq.s32.totalorder %v30_v11, %v33_v12 }
  0x8c   :  { %v35_v13 = vsel %vm34_vm1, %v12_v0, 0.0 }
  0x8d   :  { %v36_v14 = vsel %vm14_vm0, %v35_v13, 0.0 }
  0x8e   :  { %37 = vadd.xlane.f32.xlu1 %v36_v14 }
  0xf7   :  { %v23_v15 = vpop.xlane.xlu1 %22 }
  0xf8   :  { %90 = vlog2.f32 %v23_v15 }
  0xfe   :  { %v91_v16 = vpop.eup %90 }
  0xff   :  { %v25_v17 = vmul.f32 0.6931472, %v91_v16 }
 0x101   :  { %v38_v18 = vpop.xlane.xlu1 %37  ;;  %v39_v19 = vadd.f32 %v25_v17, %v17_v5 }
 0x102   :  { %v42_v20 = vsub.f32 %v38_v18, %v17_v5 }
 0x103   :  { %v40_v22 = vmul.f32 32.0, %v39_v19 }
 0x104   :  { %v43_v23 = vsub.f32 %v42_v20, %v25_v17 }
 0x105   :  { %v41_v24 = vsub.f32 %v28_v21, %v40_v22 }
 0x106   :  { %v45_v25 = vmul.f32 0.8967742, %v43_v23 }
 0x107   :  { %v44_v26 = vmul.f32 0.0032258064, %v41_v24 }
 0x109   :  { %v46_v27 = vadd.f32 %v45_v25, %v44_v26 }
 0x10b   :  { %v47_v28 = vsub.f32 0.0, %v46_v27 }
 0x10d   :  { %v56_v29 = vsel %vm55_vm2, %v47_v28, 0.0 }
 0x10e   :  { %57 = vadd.xlane.f32.xlu2 %v56_v29 }
 0x181   :  { %v58_v30 = vpop.xlane.xlu2 %57 }
 0x182   :  { %v59_v31 = vrot.slane %v58_v30, 4 }
 0x184   :  { %v60_v32 = vadd.f32 %v59_v31, %v58_v30 }
 0x186   :  { %v61_v33 = vrot.slane %v60_v32, 2 }
 0x188   :  { %v62_v34 = vadd.f32 %v61_v33, %v60_v32 }
 0x18a   :  { %v63_v35 = vrot.slane %v62_v34, 1 }
 0x18c   :  { %v64_v36 = vadd.f32 %v63_v35, %v62_v34 }
 0x18e   :  { %83 = vpush %v64_v36 }
 0x1bf   :  { %s84_s14 = spop %83 }
 0x1c0   :  { %67 = sst [smem:[#allocation2]] %s84_s14 }
 0x1c1   :  { %76 = dma.smem_to_hbm %s107_s15, 16, %s74_s13, [#allocation3]  }
 0x1c2   :  { %104 = dma.done.wait [#allocation3], 16  }
 0x1c3   :  { %105 = vsyncadd [#allocation3], 4294967280 }
 0x1c4   :  { %81 = sfence }
 0x1c5   :  { %82 = vsyncpa [#allocation3], 1 }

</bundles_post_ra>
